<compile_context>
chip_gen: v7x
topology: tpu7x:2x2x1
jax: 0.10.0
libtpu: 0.0.40
codegen_flags: <defaults>
</compile_context>

<pallas_src>
import functools

import jax
import jax.numpy as jnp
import numpy as np
from jax.experimental import pallas as pl
from jax.experimental.pallas import tpu as pltpu


def _weight_fake_quant_kernel(w_ref, wq_ref, *, w_bit):
    """One-shot per-tensor asymmetric fake-quantization of the full weight."""
    w = w_ref[...].astype(jnp.float32)
    w_min = jnp.min(w)
    w_max = jnp.max(w)
    qmax = jnp.float32(2 ** w_bit - 1)
    # Guard s == 0 (constant weight); no effect for normal weights.
    s = jnp.maximum((w_max - w_min) / qmax, jnp.float32(1e-12))
    z = -jnp.round(w_min / s)
    wq_ref[...] = (jnp.clip(jnp.round(w / s + z), 0.0, qmax) - z) * s


def _linear_relu_kernel(x_ref, wt_ref, b_ref, o_ref, pmin_ref, pmax_ref):
    """One (tile_m, tile_n) output tile: bf16 MXU matmul -> +bias -> ReLU,
    plus per-tile (min, max) partials for act_range."""
    # x_ref: (tile_m, K) bf16, wt_ref: (K, tile_n) bf16 -> f32 accumulate.
    acc = jnp.dot(x_ref[...], wt_ref[...], preferred_element_type=jnp.float32)
    out = acc + b_ref[...].astype(jnp.float32)        # (1, tile_n) broadcasts
    out = jnp.maximum(out, 0.0)                       # ReLU activation
    o_ref[...] = out.astype(o_ref.dtype)
    # Per-tile range partials (reduced to 2 scalars in the wrapper); this
    # keeps both grid axes "parallel" (no in-kernel running accumulator).
    pmin_ref[...] = jnp.full(pmin_ref.shape, jnp.min(out), jnp.float32)
    pmax_ref[...] = jnp.full(pmax_ref.shape, jnp.max(out), jnp.float32)


def fused_linear(x, weight, bias, *, w_bit=8, tile_m=256, tile_n=256):
    """Training-mode FusedLinear forward. Returns (out, act_range).

    tile_m / tile_n default to 256 (v6e/v7x MXU); use 128 on v5e.
    """
    M, K = x.shape
    N, K2 = weight.shape
    assert K == K2
    tile_m = min(tile_m, M)
    tile_n = min(tile_n, N)
    assert M % tile_m == 0 and N % tile_n == 0
    assert tile_m == M or tile_m % 8 == 0, "tile_m must be sublane-aligned"
    assert tile_n == N or tile_n % 128 == 0, "tile_n must be lane-aligned"
    gm, gn = M // tile_m, N // tile_n

    # ---- one-time weight prep (hoisted out of the hot loop) ---------------
    w_fq = pl.pallas_call(
        functools.partial(_weight_fake_quant_kernel, w_bit=w_bit),
        out_shape=jax.ShapeDtypeStruct((N, K), jnp.float32),
    )(weight)
    # Single XLA transpose + cast: (N, K) f32 -> (K, N) bf16 for the MXU.
    wt = jnp.transpose(w_fq).astype(jnp.bfloat16)
    x_bf16 = x.astype(jnp.bfloat16)
    bias2d = bias.reshape(1, N).astype(jnp.float32)

    flops = 2 * M * N * K
    bytes_accessed = (M * K * 2 + K * N * 2 + N * 4 + M * N * 4
                      + 2 * gm * 8 * gn * 128 * 4)

    out, pmin, pmax = pl.pallas_call(
        _linear_relu_kernel,
        out_shape=(
            jax.ShapeDtypeStruct((M, N), jnp.float32),
            jax.ShapeDtypeStruct((gm * 8, gn * 128), jnp.float32),  # min parts
            jax.ShapeDtypeStruct((gm * 8, gn * 128), jnp.float32),  # max parts
        ),
        grid_spec=pltpu.PrefetchScalarGridSpec(
            num_scalar_prefetch=0,
            grid=(gm, gn),
            in_specs=[
                pl.BlockSpec((tile_m, K), lambda i, j: (i, 0)),     # x tile
                pl.BlockSpec((K, tile_n), lambda i, j: (0, j)),     # w^T tile
                pl.BlockSpec((1, tile_n), lambda i, j: (0, j)),     # bias tile
            ],
            out_specs=[
                pl.BlockSpec((tile_m, tile_n), lambda i, j: (i, j)),  # out
                pl.BlockSpec((8, 128), lambda i, j: (i, j)),          # min part
                pl.BlockSpec((8, 128), lambda i, j: (i, j)),          # max part
            ],
        ),
        compiler_params=pltpu.CompilerParams(
            dimension_semantics=("parallel", "parallel"),
        ),
        cost_estimate=pl.CostEstimate(
            flops=flops, transcendentals=0, bytes_accessed=bytes_accessed),
    )(x_bf16, wt, bias2d)

    act_range = jnp.stack([jnp.min(pmin), jnp.max(pmax)])
    return out, act_range


def _reference(x, weight, bias, w_bit=8):
    """Pure-JAX reference of the same training-mode forward (same bf16
    operand / f32-accumulate matmul precision as the kernel's MXU path)."""
    w = weight.astype(jnp.float32)
    w_min, w_max = jnp.min(w), jnp.max(w)
    qmax = 2.0 ** w_bit - 1.0
    s = jnp.maximum((w_max - w_min) / qmax, 1e-12)
    z = -jnp.round(w_min / s)
    w_fq = (jnp.clip(jnp.round(w / s + z), 0.0, qmax) - z) * s
    out = jnp.dot(x.astype(jnp.bfloat16), w_fq.T.astype(jnp.bfloat16),
                  preferred_element_type=jnp.float32)
    out = out + bias
    out = jnp.maximum(out, 0.0)
    return out, jnp.stack([jnp.min(out), jnp.max(out)])


if __name__ == "__main__":
    batch, in_features, out_features = 512, 128, 512
    key = jax.random.PRNGKey(0)
    kx, kw, kb = jax.random.split(key, 3)

    # Deterministic parameter init (torch.nn.Linear-style uniform bounds).
    bound = 1.0 / np.sqrt(in_features)
    x = jax.random.normal(kx, (batch, in_features), dtype=jnp.float32)
    weight = jax.random.uniform(kw, (out_features, in_features),
                                minval=-bound, maxval=bound, dtype=jnp.float32)
    bias = jax.random.uniform(kb, (out_features,),
                              minval=-bound, maxval=bound, dtype=jnp.float32)

    out, act_range = fused_linear(x, weight, bias, w_bit=8,
                                  tile_m=256, tile_n=256)
    jax.block_until_ready((out, act_range))

    ref_out, ref_range = _reference(x, weight, bias, w_bit=8)
    np.testing.assert_allclose(np.asarray(out), np.asarray(ref_out),
                               rtol=1e-4, atol=1e-4)
    np.testing.assert_allclose(np.asarray(act_range), np.asarray(ref_range),
                               rtol=1e-4, atol=1e-4)
    print("KERNEL_OK")
</pallas_src>

<mosaic_0001>
module attributes {stable_mosaic.version = 11 : i64} {
  func.func @_weight_fake_quant_kernel(%arg0: memref<512x128xf32, #tpu.memory_space<vmem>>, %arg1: memref<512x128xf32, #tpu.memory_space<vmem>>) attributes {dimension_semantics = [], scalar_prefetch = 0 : i64, scratch_operands = 0 : i64, tpu.core_type = #tpu.core_type<tc>} {
    %c0 = arith.constant 0 : index
    %c0_0 = arith.constant 0 : index
    %0 = vector.load %arg0[%c0, %c0_0] : memref<512x128xf32, #tpu.memory_space<vmem>>, vector<512x128xf32>
    %1 = vector.shape_cast %0 : vector<512x128xf32> to vector<1x512x128xf32>
    %cst = arith.constant dense<0x7F800000> : vector<1xf32>
    %2 = vector.multi_reduction <minimumf>, %1, %cst [1, 2] : vector<1x512x128xf32> to vector<1xf32>
    %3 = vector.shape_cast %2 : vector<1xf32> to vector<1x1x1xf32>
    %4 = vector.extract %3[0, 0, 0] : f32 from vector<1x1x1xf32>
    %5 = vector.shape_cast %0 : vector<512x128xf32> to vector<1x512x128xf32>
    %cst_1 = arith.constant dense<0xFF800000> : vector<1xf32>
    %6 = vector.multi_reduction <maximumf>, %5, %cst_1 [1, 2] : vector<1x512x128xf32> to vector<1xf32>
    %7 = vector.shape_cast %6 : vector<1xf32> to vector<1x1x1xf32>
    %8 = vector.extract %7[0, 0, 0] : f32 from vector<1x1x1xf32>
    %9 = arith.subf %8, %4 : f32
    %cst_2 = arith.constant 2.550000e+02 : f32
    %10 = arith.divf %9, %cst_2 : f32
    %cst_3 = arith.constant 9.99999996E-13 : f32
    %11 = arith.maximumf %10, %cst_3 : f32
    %12 = arith.divf %4, %11 : f32
    %13 = math.roundeven %12 : f32
    %cst_4 = arith.constant 0.000000e+00 : f32
    %14 = arith.subf %cst_4, %13 : f32
    %15 = vector.broadcast %11 : f32 to vector<512x128xf32>
    %16 = arith.divf %0, %15 : vector<512x128xf32>
    %17 = vector.broadcast %14 : f32 to vector<512x128xf32>
    %18 = arith.addf %16, %17 : vector<512x128xf32>
    %19 = math.roundeven %18 : vector<512x128xf32>
    %cst_5 = arith.constant 0.000000e+00 : f32
    %cst_6 = arith.constant 2.550000e+02 : f32
    %20 = vector.broadcast %cst_5 : f32 to vector<512x128xf32>
    %21 = arith.maximumf %20, %19 : vector<512x128xf32>
    %22 = vector.broadcast %cst_6 : f32 to vector<512x128xf32>
    %23 = arith.minimumf %22, %21 : vector<512x128xf32>
    %24 = vector.broadcast %14 : f32 to vector<512x128xf32>
    %25 = arith.subf %23, %24 : vector<512x128xf32>
    %26 = vector.broadcast %11 : f32 to vector<512x128xf32>
    %27 = arith.mulf %25, %26 : vector<512x128xf32>
    %c0_7 = arith.constant 0 : index
    %c0_8 = arith.constant 0 : index
    %28 = vector.load %arg1[%c0_7, %c0_8] : memref<512x128xf32, #tpu.memory_space<vmem>>, vector<512x128xf32>
    tpu.vector_store %arg1[%c0_7, %c0_8], %27 {strides = array<i32>} : memref<512x128xf32, #tpu.memory_space<vmem>>, vector<512x128xf32>,
    return
  }
}

</mosaic_0001>

<bundles_post_ra>
// kernel: tpu_custom_call.1
= control target key start
LH: loop header
LB: loop body
LE: loop exit
PB: predicated region body
PF: predicated region fallthrough
CT: control target
= control target key end

     0   :  { %6 = vsyncpa [#allocation3], 0  ;;  %s2571_s0 = inlined_call_operand.hbm [shape: f32[512,128], index: 0, kind: input, shape index: {}]   ;;  %s2572_s1 = inlined_call_operand.hbm [shape: f32[512,128], index: 1, kind: output, shape index: {}]  }
   0x1   :  { %7 = vsyncpa [#allocation4], 0  ;;  %s906_s6 = smov [#allocation2]   ;;  %s858_s10 = scalar_lea.hbm %s2571_s0, 8192 }
   0x2   :  { %s13_s7 = sshll.u32 %s906_s6, 4  ;;  %p859_p0 = scmp.ne.s32.totalorder %s2571_s0, %s858_s10  ;;  %s14_s7 = int_to_ptr.vmem [resolvable:$true] %s13_s7 }
   0x3   :  { %p862_p1 = scmp.lt.u32.totalorder %s858_s10, %s2571_s0 }
   0x5   :  { %p864_p2 = pnand %p862_p1, %p859_p0 }
   0x7   :  { %867 = shalt.err (!%p864_p2)
}
   0x8   :  { %s868_s15 = scalar_lea.vmem %s14_s7, 8192  ;;  %p873_p4 = scmp.lt.s32.totalorder %s14_s7, %s14_s7 }
   0x9   :  { %p869_p3 = scmp.ne.s32.totalorder %s14_s7, %s868_s15  ;;  %p874_p5 = scmp.lt.s32.totalorder %s868_s15, %s868_s15 }
   0xb   :  { %p875_p6 = por %p874_p5, %p873_p4 }
   0xd   :  { %p876_p7 = pnand %p875_p6, %p869_p3 }
   0xf   :  { %879 = shalt.err (!%p876_p7)
}
  0x10   :  { %s907_s16 = smov 128   ;;  %s908_s17 = smov 8  }
  0x11   :  { %19 = dma.hbm_to_vmem [thread:$0]  %s2571_s0, 8192, %s14_s7, [#allocation3], %s907_s16, %s907_s16, %s908_s17  }
  0x12   :  { %902 = dma.done.wait [#allocation3], 8192  }
  0x13   :  { %903 = vsyncadd [#allocation3], 4294959104  ;;  %v936_v0 = vld [vmem:[#allocation2] sm:$0xff]  ;;  %v938_v1 = vld [vmem:[#allocation2 + $0x8] sm:$0xff]  ;;  %s909_s23 = smov 1e-12  }
  0x14   :  { %v940_v2 = vld [vmem:[#allocation2 + $0x10] sm:$0xff]  ;;  %v942_v3 = vld [vmem:[#allocation2 + $0x18] sm:$0xff]  ;;  %v944_v4 = vld [vmem:[#allocation2 + $0x20] sm:$0xff]  ;;  %s910_s6 = smov [#allocation5]  }
  0x15   :  { %2637 = vst [vmem:[#allocation8_spill] sm:$0xff] %v940_v2  ;;  %2638 = vst [vmem:[#allocation9_spill] sm:$0xff] %v942_v3  ;;  %v946_v5 = vld [vmem:[#allocation2 + $0x28] sm:$0xff]  ;;  %v948_v6 = vld [vmem:[#allocation2 + $0x30] sm:$0xff]  ;;  %v87_v9 = vmin.f32 %v936_v0, %v944_v4  ;;  %s769_s7 = sshll.u32 %s910_s6, 4  ;;  %s770_s7 = int_to_ptr.vmem [resolvable:$true] %s769_s7 }
  0x16   :  { %v950_v7 = vld [vmem:[#allocation2 + $0x38] sm:$0xff]  ;;  %v952_v8 = vld [vmem:[#allocation2 + $0x40] sm:$0xff]  ;;  %v88_v10 = vmin.f32 %v938_v1, %v946_v5  ;;  %v958_v11 = vld [vmem:[#allocation2 + $0x48] sm:$0xff]  ;;  %v89_v13 = vmin.f32 %v940_v2, %v948_v6  ;;  %s880_s8 = scalar_lea.vmem %s770_s7, 8192  ;;  %p885_p10 = scmp.lt.s32.totalorder %s770_s7, %s770_s7 }
  0x17   :  { %2639 = vst [vmem:[#allocation10_spill] sm:$0xff] %v950_v7  ;;  %2640 = vst [vmem:[#allocation11_spill] sm:$0xff] %v952_v8  ;;  %v960_v12 = vld [vmem:[#allocation2 + $0x50] sm:$0xff]  ;;  %v90_v14 = vmin.f32 %v942_v3, %v950_v7  ;;  %v163_v15 = vmax.f32 %v958_v11, %v952_v8  ;;  %v968_v16 = vld [vmem:[#allocation2 + $0x58] sm:$0xff]  ;;  %v91_v17 = vmin.f32 %v87_v9, %v952_v8  ;;  %p881_p9 = scmp.ne.s32.totalorder %s770_s7, %s880_s8  ;;  %p886_p11 = scmp.lt.s32.totalorder %s880_s8, %s880_s8 }
  0x18   :  { %2641 = vst [vmem:[#allocation12_spill] sm:$0xff] %v958_v11  ;;  %2642 = vst [vmem:[#allocation13_spill] sm:$0xff] %v960_v12  ;;  %v92_v18 = vmin.f32 %v88_v10, %v958_v11  ;;  %v972_v19 = vld [vmem:[#allocation2 + $0x60] sm:$0xff]  ;;  %v974_v20 = vld [vmem:[#allocation2 + $0x68] sm:$0xff]  ;;  %v93_v21 = vmin.f32 %v89_v13, %v960_v12 }
  0x19   :  { %2643 = vst [vmem:[#allocation14_spill] sm:$0xff] %v968_v16  ;;  %2644 = vst [vmem:[#allocation15_spill] sm:$0xff] %v972_v19  ;;  %v94_v22 = vmin.f32 %v90_v14, %v968_v16  ;;  %v164_v23 = vmax.f32 %v960_v12, %v163_v15  ;;  %v979_v24 = vld [vmem:[#allocation2 + $0x70] sm:$0xff]  ;;  %v981_v25 = vld [vmem:[#allocation2 + $0x78] sm:$0xff]  ;;  %v95_v26 = vmin.f32 %v91_v17, %v972_v19  ;;  %p887_p12 = por %p886_p11, %p885_p10 }
  0x1a   :  { %2645 = vst [vmem:[#allocation16_spill] sm:$0xff] %v974_v20  ;;  %2646 = vst [vmem:[#allocation17_spill] sm:$0xff] %v979_v24  ;;  %v96_v27 = vmin.f32 %v92_v18, %v974_v20  ;;  %v985_v28 = vld [vmem:[#allocation2 + $0x80] sm:$0xff]  ;;  %v987_v29 = vld [vmem:[#allocation2 + $0x88] sm:$0xff]  ;;  %v97_v30 = vmin.f32 %v93_v21, %v979_v24 }
  0x1b   :  { %2647 = vst [vmem:[#allocation18_spill] sm:$0xff] %v981_v25  ;;  %2648 = vst [vmem:[#allocation19_spill] sm:$0xff] %v985_v28  ;;  %v98_v31 = vmin.f32 %v94_v22, %v981_v25  ;;  %v165_v32 = vmax.f32 %v968_v16, %v164_v23  ;;  %v992_v33 = vld [vmem:[#allocation2 + $0x90] sm:$0xff]  ;;  %v994_v34 = vld [vmem:[#allocation2 + $0x98] sm:$0xff]  ;;  %v99_v35 = vmin.f32 %v95_v26, %v985_v28  ;;  %p888_p13 = pnand %p887_p12, %p881_p9 }
  0x1c   :  { %2649 = vst [vmem:[#allocation20_spill] sm:$0xff] %v987_v29  ;;  %2650 = vst [vmem:[#allocation21_spill] sm:$0xff] %v992_v33  ;;  %v100_v36 = vmin.f32 %v96_v27, %v987_v29  ;;  %v998_v37 = vld [vmem:[#allocation2 + $0xa0] sm:$0xff]  ;;  %v1000_v38 = vld [vmem:[#allocation2 + $0xa8] sm:$0xff]  ;;  %v101_v39 = vmin.f32 %v97_v30, %v992_v33 }
  0x1d   :  { %2651 = vst [vmem:[#allocation22_spill] sm:$0xff] %v994_v34  ;;  %2652 = vst [vmem:[#allocation23_spill] sm:$0xff] %v998_v37  ;;  %v102_v40 = vmin.f32 %v98_v31, %v994_v34  ;;  %v166_v41 = vmax.f32 %v972_v19, %v165_v32  ;;  %v1005_v42 = vld [vmem:[#allocation2 + $0xb0] sm:$0xff]  ;;  %v1007_v43 = vld [vmem:[#allocation2 + $0xb8] sm:$0xff]  ;;  %v103_v44 = vmin.f32 %v99_v35, %v998_v37 }
  0x1e   :  { %2653 = vst [vmem:[#allocation24_spill] sm:$0xff] %v1000_v38  ;;  %v104_v45 = vmin.f32 %v100_v36, %v1000_v38  ;;  %v1011_v46 = vld [vmem:[#allocation2 + $0xc0] sm:$0xff]  ;;  %v1013_v47 = vld [vmem:[#allocation2 + $0xc8] sm:$0xff]  ;;  %v105_v48 = vmin.f32 %v101_v39, %v1005_v42  ;;  %v1018_v51 = vld [vmem:[#allocation2 + $0xd0] sm:$0xff] }
  0x1f   :  { %v106_v49 = vmin.f32 %v102_v40, %v1007_v43  ;;  %v167_v50 = vmax.f32 %v974_v20, %v166_v41  ;;  %v1020_v52 = vld [vmem:[#allocation2 + $0xd8] sm:$0xff]  ;;  %v107_v53 = vmin.f32 %v103_v44, %v1011_v46  ;;  %v1024_v55 = vld [vmem:[#allocation2 + $0xe0] sm:$0xff]  ;;  %v1026_v56 = vld [vmem:[#allocation2 + $0xe8] sm:$0xff] }
  0x20   :  { %v108_v54 = vmin.f32 %v104_v45, %v1013_v47  ;;  %v109_v57 = vmin.f32 %v105_v48, %v1018_v51  ;;  %v1031_v60 = vld [vmem:[#allocation2 + $0xf0] sm:$0xff]  ;;  %v1033_v61 = vld [vmem:[#allocation2 + $0xf8] sm:$0xff]  ;;  %v1037_v9 = vld [vmem:[#allocation2 + $0x100] sm:$0xff] }
  0x21   :  { %v110_v58 = vmin.f32 %v106_v49, %v1020_v52  ;;  %v168_v59 = vmax.f32 %v979_v24, %v167_v50  ;;  %v111_v62 = vmin.f32 %v107_v53, %v1024_v55  ;;  %v1039_v10 = vld [vmem:[#allocation2 + $0x108] sm:$0xff]  ;;  %v1044_v17 = vld [vmem:[#allocation2 + $0x110] sm:$0xff]  ;;  %v1046_v18 = vld [vmem:[#allocation2 + $0x118] sm:$0xff] }
  0x22   :  { %v112_v63 = vmin.f32 %v108_v54, %v1026_v56  ;;  %v113_v13 = vmin.f32 %v109_v57, %v1031_v60  ;;  %v1050_v23 = vld [vmem:[#allocation2 + $0x120] sm:$0xff]  ;;  %v1052_v26 = vld [vmem:[#allocation2 + $0x128] sm:$0xff]  ;;  %v1057_v32 = vld [vmem:[#allocation2 + $0x130] sm:$0xff] }
  0x23   :  { %v114_v14 = vmin.f32 %v110_v58, %v1033_v61  ;;  %v169_v15 = vmax.f32 %v981_v25, %v168_v59  ;;  %v115_v21 = vmin.f32 %v111_v62, %v1037_v9  ;;  %v1059_v35 = vld [vmem:[#allocation2 + $0x138] sm:$0xff]  ;;  %v1063_v40 = vld [vmem:[#allocation2 + $0x140] sm:$0xff]  ;;  %v1065_v41 = vld [vmem:[#allocation2 + $0x148] sm:$0xff] }
  0x24   :  { %v116_v22 = vmin.f32 %v112_v63, %v1039_v10  ;;  %v117_v27 = vmin.f32 %v113_v13, %v1044_v17  ;;  %v1070_v49 = vld [vmem:[#allocation2 + $0x150] sm:$0xff]  ;;  %v1072_v50 = vld [vmem:[#allocation2 + $0x158] sm:$0xff]  ;;  %v1076_v57 = vld [vmem:[#allocation2 + $0x160] sm:$0xff] }
  0x25   :  { %v118_v30 = vmin.f32 %v114_v14, %v1046_v18  ;;  %v170_v31 = vmax.f32 %v985_v28, %v169_v15  ;;  %v119_v36 = vmin.f32 %v115_v21, %v1050_v23  ;;  %v1078_v58 = vld [vmem:[#allocation2 + $0x168] sm:$0xff]  ;;  %v1083_v13 = vld [vmem:[#allocation2 + $0x170] sm:$0xff]  ;;  %v1085_v14 = vld [vmem:[#allocation2 + $0x178] sm:$0xff] }
  0x26   :  { %v120_v39 = vmin.f32 %v116_v22, %v1052_v26  ;;  %v121_v44 = vmin.f32 %v117_v27, %v1057_v32  ;;  %v1089_v22 = vld [vmem:[#allocation2 + $0x180] sm:$0xff]  ;;  %v1091_v27 = vld [vmem:[#allocation2 + $0x188] sm:$0xff]  ;;  %v1115_v28 = vld [vmem:[#allocation2 + $0x1d8] sm:$0xff] }
  0x27   :  { %v122_v45 = vmin.f32 %v118_v30, %v1059_v35  ;;  %v171_v48 = vmax.f32 %v987_v29, %v170_v31  ;;  %v123_v53 = vmin.f32 %v119_v36, %v1063_v40  ;;  %v1113_v29 = vld [vmem:[#allocation2 + $0x1c0] sm:$0xff]  ;;  %2654 = vst [vmem:[#allocation25_spill] sm:$0xff] %v1115_v28  ;;  %v1119_v25 = vld [vmem:[#allocation2 + $0x1c8] sm:$0xff]  ;;  %v1130_v19 = vld [vmem:[#allocation2 + $0x1f0] sm:$0xff] }
  0x28   :  { %v124_v54 = vmin.f32 %v120_v39, %v1065_v41  ;;  %v125_v59 = vmin.f32 %v121_v44, %v1070_v49  ;;  %v1096_v39 = vld [vmem:[#allocation2 + $0x190] sm:$0xff]  ;;  %v1098_v44 = vld [vmem:[#allocation2 + $0x198] sm:$0xff]  ;;  %v1121_v24 = vld [vmem:[#allocation2 + $0x1e0] sm:$0xff]  ;;  %2657 = vst [vmem:[#allocation28_spill] sm:$0xff] %v1130_v19 }
  0x29   :  { %v126_v62 = vmin.f32 %v122_v45, %v1072_v50  ;;  %v172_v63 = vmax.f32 %v992_v33, %v171_v48  ;;  %v127_v15 = vmin.f32 %v123_v53, %v1076_v57  ;;  %v1102_v53 = vld [vmem:[#allocation2 + $0x1a0] sm:$0xff]  ;;  %v1106_v33 = vld [vmem:[#allocation2 + $0x1b0] sm:$0xff]  ;;  %2655 = vst [vmem:[#allocation26_spill] sm:$0xff] %v1121_v24  ;;  %v1123_v20 = vld [vmem:[#allocation2 + $0x1e8] sm:$0xff] }
  0x2a   :  { %v128_v21 = vmin.f32 %v124_v54, %v1078_v58  ;;  %v129_v30 = vmin.f32 %v125_v59, %v1083_v13  ;;  %v1104_v54 = vld [vmem:[#allocation2 + $0x1a8] sm:$0xff]  ;;  %2656 = vst [vmem:[#allocation27_spill] sm:$0xff] %v1123_v20  ;;  %v1132_v16 = vld [vmem:[#allocation2 + $0x1f8] sm:$0xff] }
  0x2b   :  { %v130_v31 = vmin.f32 %v126_v62, %v1085_v14  ;;  %v173_v36 = vmax.f32 %v994_v34, %v172_v63  ;;  %v131_v45 = vmin.f32 %v127_v15, %v1089_v22  ;;  %v1111_v34 = vld [vmem:[#allocation2 + $0x1b8] sm:$0xff]  ;;  %2658 = vst [vmem:[#allocation29_spill] sm:$0xff] %v1132_v16 }
  0x2c   :  { %v132_v48 = vmin.f32 %v128_v21, %v1091_v27  ;;  %v133_v59 = vmin.f32 %v129_v30, %v1096_v39 }
  0x2d   :  { %v134_v62 = vmin.f32 %v130_v31, %v1098_v44  ;;  %v174_v63 = vmax.f32 %v998_v37, %v173_v36  ;;  %v135_v15 = vmin.f32 %v131_v45, %v1102_v53  ;;  %v1128_v37 = vld [vmem:[#allocation2 + $0x1d0] sm:$0xff] }
  0x2e   :  { %v136_v21 = vmin.f32 %v132_v48, %v1104_v54  ;;  %v137_v30 = vmin.f32 %v133_v59, %v1106_v33 }
  0x2f   :  { %v138_v31 = vmin.f32 %v134_v62, %v1111_v34  ;;  %v175_v36 = vmax.f32 %v1000_v38, %v174_v63  ;;  %v139_v45 = vmin.f32 %v135_v15, %v1113_v29 }
  0x30   :  { %v140_v48 = vmin.f32 %v136_v21, %v1119_v25  ;;  %v141_v12 = vmin.f32 %v137_v30, %v1128_v37 }
  0x31   :  { %v142_v11 = vmin.f32 %v138_v31, %v1115_v28  ;;  %v176_v59 = vmax.f32 %v1005_v42, %v175_v36  ;;  %v143_v62 = vmin.f32 %v139_v45, %v1121_v24 }
  0x32   :  { %v144_v63 = vmin.f32 %v140_v48, %v1123_v20  ;;  %v145_v38 = vmin.f32 %v141_v12, %v1130_v19 }
  0x33   :  { %v146_v8 = vmin.f32 %v142_v11, %v1132_v16  ;;  %v177_v3 = vmax.f32 %v1007_v43, %v176_v59 }
  0x34   :  { %v147_v7 = vmin.f32 %v143_v62, %v144_v63 }
  0x35   :  { %v148_v15 = vmin.f32 %v145_v38, %v146_v8  ;;  %v178_v21 = vmax.f32 %v1011_v46, %v177_v3 }
  0x37   :  { %v149_v2 = vmin.f32 %v147_v7, %v148_v15  ;;  %v179_v30 = vmax.f32 %v1013_v47, %v178_v21 }
  0x39   :  { %150 = vmin.xlane.f32.xlu0 %v149_v2  ;;  %v180_v31 = vmax.f32 %v1018_v51, %v179_v30 }
  0x3b   :  { %v181_v36 = vmax.f32 %v1020_v52, %v180_v31 }
  0x3d   :  { %v182_v45 = vmax.f32 %v1024_v55, %v181_v36 }
  0x3f   :  { %v183_v12 = vmax.f32 %v1026_v56, %v182_v45 }
  0x41   :  { %v184_v11 = vmax.f32 %v1031_v60, %v183_v12 }
  0x43   :  { %v185_v48 = vmax.f32 %v1033_v61, %v184_v11 }
  0x45   :  { %v186_v8 = vmax.f32 %v1037_v9, %v185_v48 }
  0x47   :  { %v187_v3 = vmax.f32 %v1039_v10, %v186_v8 }
  0x49   :  { %v188_v7 = vmax.f32 %v1044_v17, %v187_v3 }
  0x4b   :  { %v189_v2 = vmax.f32 %v1046_v18, %v188_v7 }
  0x4d   :  { %v190_v38 = vmax.f32 %v1050_v23, %v189_v2 }
  0x4f   :  { %v191_v59 = vmax.f32 %v1052_v26, %v190_v38 }
  0x51   :  { %v192_v62 = vmax.f32 %v1057_v32, %v191_v59 }
  0x53   :  { %v193_v63 = vmax.f32 %v1059_v35, %v192_v62 }
  0x55   :  { %v194_v15 = vmax.f32 %v1063_v40, %v193_v63 }
  0x57   :  { %v195_v21 = vmax.f32 %v1065_v41, %v194_v15 }
  0x59   :  { %v196_v30 = vmax.f32 %v1070_v49, %v195_v21 }
  0x5b   :  { %v197_v31 = vmax.f32 %v1072_v50, %v196_v30 }
  0x5d   :  { %v198_v36 = vmax.f32 %v1076_v57, %v197_v31 }
  0x5f   :  { %v199_v45 = vmax.f32 %v1078_v58, %v198_v36 }
  0x61   :  { %v200_v12 = vmax.f32 %v1083_v13, %v199_v45 }
  0x63   :  { %v201_v11 = vmax.f32 %v1085_v14, %v200_v12  ;;  %v159_v12 = vmax.f32 %v936_v0, %v944_v4 }
  0x65   :  { %v202_v48 = vmax.f32 %v1089_v22, %v201_v11 }
  0x67   :  { %v203_v8 = vmax.f32 %v1091_v27, %v202_v48  ;;  %v160_v48 = vmax.f32 %v938_v1, %v946_v5 }
  0x69   :  { %v204_v3 = vmax.f32 %v1096_v39, %v203_v8 }
  0x6b   :  { %v205_v7 = vmax.f32 %v1098_v44, %v204_v3  ;;  %v2659_v3 = vld [vmem:[#allocation8_spill] sm:$0xff] }
  0x6d   :  { %v206_v2 = vmax.f32 %v1102_v53, %v205_v7  ;;  %v161_v7 = vmax.f32 %v2659_v3, %v948_v6 }
  0x6f   :  { %v207_v38 = vmax.f32 %v1104_v54, %v206_v2 }
  0x71   :  { %v208_v59 = vmax.f32 %v1106_v33, %v207_v38  ;;  %v2660_v38 = vld [vmem:[#allocation10_spill] sm:$0xff] }
  0x73   :  { %v209_v62 = vmax.f32 %v1111_v34, %v208_v59  ;;  %v2661_v59 = vld [vmem:[#allocation9_spill] sm:$0xff] }
  0x75   :  { %v210_v63 = vmax.f32 %v1113_v29, %v209_v62  ;;  %v162_v62 = vmax.f32 %v2661_v59, %v2660_v38 }
  0x77   :  { %v211_v15 = vmax.f32 %v1119_v25, %v210_v63 }
  0x79   :  { %v212_v21 = vmax.f32 %v1128_v37, %v211_v15 }
  0x7b   :  { %v213_v30 = vmax.f32 %v1115_v28, %v212_v21 }
  0x7d   :  { %v214_v31 = vmax.f32 %v1121_v24, %v213_v30 }
  0x7f   :  { %v215_v36 = vmax.f32 %v1123_v20, %v214_v31 }
  0x81   :  { %v216_v45 = vmax.f32 %v1130_v19, %v215_v36 }
  0x83   :  { %v217_v11 = vmax.f32 %v1132_v16, %v216_v45 }
  0x85   :  { %v218_v8 = vmax.f32 %v159_v12, %v217_v11 }
  0x87   :  { %v219_v2 = vmax.f32 %v160_v48, %v218_v8 }
  0x89   :  { %v220_v63 = vmax.f32 %v161_v7, %v219_v2 }
  0x8b   :  { %v221_v15 = vmax.f32 %v162_v62, %v220_v63  ;;  %v2663_v62 = vld [vmem:[#allocation11_spill] sm:$0xff]  ;;  %v2664_v63 = vld [vmem:[#allocation12_spill] sm:$0xff] }
  0x8d   :  { %222 = vmax.xlane.f32.xlu0 %v221_v15  ;;  %v2665_v15 = vld [vmem:[#allocation13_spill] sm:$0xff] }
  0xc6   :  { %v151_v21 = vpop.xlane.xlu0 %150 }
  0xc7   :  { %v152_v30 = vrot.slane %v151_v21, 4 }
  0xc9   :  { %v153_v31 = vmin.f32 %v151_v21, %v152_v30  ;;  %v2666_v21 = vld [vmem:[#allocation14_spill] sm:$0xff]  ;;  %v2667_v30 = vld [vmem:[#allocation15_spill] sm:$0xff] }
  0xcb   :  { %v154_v36 = vrot.slane %v153_v31, 2 }
  0xcd   :  { %v155_v19 = vmin.f32 %v153_v31, %v154_v36  ;;  %v2668_v31 = vld [vmem:[#allocation16_spill] sm:$0xff] }
  0xcf   :  { %v156_v45 = vrot.slane %v155_v19, 1 }
  0xd1   :  { %v157_v16 = vmin.f32 %v155_v19, %v156_v45  ;;  %v2669_v45 = vld [vmem:[#allocation17_spill] sm:$0xff] }
  0xd3   :  { %781 = vpush %v157_v16 }
 0x104   :  { %s782_s0 = spop %781 }
 0x11a   :  { %v223_v20 = vpop.xlane.xlu0 %222 }
 0x11b   :  { %v224_v12 = vrot.slane %v223_v20, 4 }
 0x11d   :  { %v225_v11 = vmax.f32 %v223_v20, %v224_v12 }
 0x11f   :  { %v226_v24 = vrot.slane %v225_v11, 2 }
 0x121   :  { %v227_v28 = vmax.f32 %v225_v11, %v226_v24  ;;  %v2670_v11 = vld [vmem:[#allocation18_spill] sm:$0xff] }
 0x123   :  { %v228_v48 = vrot.slane %v227_v28, 1 }
 0x125   :  { %v229_v8 = vmax.f32 %v227_v28, %v228_v48 }
 0x127   :  { %783 = vpush %v229_v8  ;;  %v2671_v8 = vld [vmem:[#allocation19_spill] sm:$0xff] }
 0x158   :  { %s784_s20 = spop %783 }
 0x159   :  { %s231_s21 = ssub.f32 %s784_s20, %s782_s0 }
 0x15b   :  { %s234_s22 = smul.f32 0.003921569, %s231_s21 }
 0x15d   :  { %s235_s24 = smax.f32 %s909_s23, %s234_s22 }
 0x15e   :  { %v1192_v7 = vstv %s235_s24 }
 0x15f   :  { %2662 = vst [vmem:[#allocation8_spill] sm:$0xff] %v1192_v7  ;;  %856 = vrcp.f32 %v1192_v7  ;;  %v2677_v7 = vld [vmem:[#allocation24_spill] sm:$0xff] }
 0x169   :  { %v1195_v19 = vpop.eup %856 }
 0x16a   :  { %785 = vpush %v1195_v19  ;;  %v1200_v16 = vmul.f32 %v1195_v19, %v936_v0  ;;  %v1204_v20 = vmul.f32 %v1195_v19, %v938_v1  ;;  %v1208_v24 = vmul.f32 %v1195_v19, %v2659_v3  ;;  %v1212_v28 = vmul.f32 %v1195_v19, %v2661_v59 }
 0x16b   :  { %v1216_v2 = vmul.f32 %v1195_v19, %v944_v4  ;;  %v1220_v0 = vmul.f32 %v1195_v19, %v946_v5  ;;  %v1224_v1 = vmul.f32 %v1195_v19, %v948_v6  ;;  %v1228_v3 = vmul.f32 %v1195_v19, %v2660_v38 }
 0x16c   :  { %v1232_v59 = vmul.f32 %v1195_v19, %v2663_v62  ;;  %v1236_v4 = vmul.f32 %v1195_v19, %v2664_v63  ;;  %v1240_v5 = vmul.f32 %v1195_v19, %v2665_v15  ;;  %v1244_v6 = vmul.f32 %v1195_v19, %v2666_v21  ;;  %v2673_v63 = vld [vmem:[#allocation20_spill] sm:$0xff]  ;;  %v2674_v21 = vld [vmem:[#allocation21_spill] sm:$0xff] }
 0x16d   :  { %v1248_v38 = vmul.f32 %v1195_v19, %v2667_v30  ;;  %v1252_v36 = vmul.f32 %v1195_v19, %v2668_v31  ;;  %v1256_v12 = vmul.f32 %v1195_v19, %v2669_v45  ;;  %v1260_v48 = vmul.f32 %v1195_v19, %v2670_v11  ;;  %v2675_v31 = vld [vmem:[#allocation22_spill] sm:$0xff]  ;;  %v2676_v11 = vld [vmem:[#allocation23_spill] sm:$0xff] }
 0x16e   :  { %v1264_v62 = vmul.f32 %v1195_v19, %v2671_v8  ;;  %v1270_v15 = vmul.f32 %v1195_v19, %v2673_v63  ;;  %v1274_v30 = vmul.f32 %v1195_v19, %v2674_v21  ;;  %v1278_v45 = vmul.f32 %v1195_v19, %v2675_v31 }
 0x16f   :  { %v1282_v8 = vmul.f32 %v1195_v19, %v2676_v11  ;;  %v1290_v63 = vmul.f32 %v1195_v19, %v1005_v42  ;;  %v1294_v21 = vmul.f32 %v1195_v19, %v1007_v43  ;;  %v1298_v31 = vmul.f32 %v1195_v19, %v1011_v46 }
 0x170   :  { %2672 = vst [vmem:[#allocation10_spill] sm:$0xff] %v1264_v62  ;;  %v1286_v62 = vmul.f32 %v1195_v19, %v2677_v7  ;;  %v1303_v11 = vmul.f32 %v1195_v19, %v1013_v47  ;;  %v1307_v7 = vmul.f32 %v1195_v19, %v1018_v51  ;;  %v1311_v42 = vmul.f32 %v1195_v19, %v1020_v52 }
 0x171   :  { %v1315_v43 = vmul.f32 %v1195_v19, %v1024_v55  ;;  %v1320_v46 = vmul.f32 %v1195_v19, %v1026_v56  ;;  %v1324_v47 = vmul.f32 %v1195_v19, %v1031_v60  ;;  %v1328_v51 = vmul.f32 %v1195_v19, %v1033_v61 }
 0x172   :  { %v1332_v52 = vmul.f32 %v1195_v19, %v1037_v9  ;;  %v1336_v55 = vmul.f32 %v1195_v19, %v1039_v10  ;;  %v1340_v56 = vmul.f32 %v1195_v19, %v1044_v17  ;;  %v1344_v60 = vmul.f32 %v1195_v19, %v1046_v18 }
 0x173   :  { %v1348_v61 = vmul.f32 %v1195_v19, %v1050_v23  ;;  %v1353_v9 = vmul.f32 %v1195_v19, %v1052_v26  ;;  %v1357_v10 = vmul.f32 %v1195_v19, %v1057_v32  ;;  %v1361_v17 = vmul.f32 %v1195_v19, %v1059_v35 }
 0x174   :  { %v1365_v18 = vmul.f32 %v1195_v19, %v1063_v40  ;;  %v1373_v23 = vmul.f32 %v1195_v19, %v1065_v41  ;;  %v1377_v26 = vmul.f32 %v1195_v19, %v1070_v49  ;;  %v1381_v32 = vmul.f32 %v1195_v19, %v1072_v50 }
 0x175   :  { %v1385_v35 = vmul.f32 %v1195_v19, %v1076_v57  ;;  %v1389_v40 = vmul.f32 %v1195_v19, %v1078_v58  ;;  %v1393_v41 = vmul.f32 %v1195_v19, %v1083_v13  ;;  %v1397_v49 = vmul.f32 %v1195_v19, %v1085_v14 }
 0x176   :  { %v1401_v50 = vmul.f32 %v1195_v19, %v1089_v22  ;;  %v1408_v57 = vmul.f32 %v1195_v19, %v1091_v27  ;;  %v1412_v58 = vmul.f32 %v1195_v19, %v1096_v39  ;;  %v1416_v13 = vmul.f32 %v1195_v19, %v1098_v44 }
 0x177   :  { %v1420_v14 = vmul.f32 %v1195_v19, %v1102_v53  ;;  %v1424_v22 = vmul.f32 %v1195_v19, %v1104_v54  ;;  %v1428_v27 = vmul.f32 %v1195_v19, %v1106_v33  ;;  %v1432_v39 = vmul.f32 %v1195_v19, %v1111_v34 }
 0x178   :  { %v1436_v44 = vmul.f32 %v1195_v19, %v1113_v29  ;;  %v1440_v53 = vmul.f32 %v1195_v19, %v1119_v25  ;;  %v1444_v54 = vmul.f32 %v1195_v19, %v1128_v37 }
 0x179   :  { %2679 = vst [vmem:[#allocation9_spill] sm:$0xff] %v1424_v22  ;;  %2680 = vst [vmem:[#allocation11_spill] sm:$0xff] %v1428_v27  ;;  %v2685_v22 = vld [vmem:[#allocation25_spill] sm:$0xff]  ;;  %v2686_v27 = vld [vmem:[#allocation26_spill] sm:$0xff] }
 0x17a   :  { %2681 = vst [vmem:[#allocation12_spill] sm:$0xff] %v1432_v39  ;;  %2682 = vst [vmem:[#allocation13_spill] sm:$0xff] %v1436_v44  ;;  %v1448_v33 = vmul.f32 %v1195_v19, %v2685_v22  ;;  %v1452_v34 = vmul.f32 %v1195_v19, %v2686_v27  ;;  %v2687_v39 = vld [vmem:[#allocation27_spill] sm:$0xff]  ;;  %v2688_v44 = vld [vmem:[#allocation28_spill] sm:$0xff] }
 0x17b   :  { %2683 = vst [vmem:[#allocation14_spill] sm:$0xff] %v1440_v53  ;;  %2684 = vst [vmem:[#allocation15_spill] sm:$0xff] %v1444_v54  ;;  %v1456_v29 = vmul.f32 %v1195_v19, %v2687_v39  ;;  %v1460_v25 = vmul.f32 %v1195_v19, %v2688_v44  ;;  %v2689_v53 = vld [vmem:[#allocation29_spill] sm:$0xff] }
 0x17c   :  { %v1464_v37 = vmul.f32 %v1195_v19, %v2689_v53  ;;  %v2691_v53 = vld [vmem:[#allocation10_spill] sm:$0xff] }
 0x19b   :  { %s786_s25 = spop %785 }
 0x19c   :  { %s1266_s26 = smul.f32 %s786_s25, %s782_s0 }
 0x19e   :  { %s240_s27 = scvt.f32.s32 %s1266_s26  ;;  %s245_s28 = sand.u32 2147483647, %s1266_s26 }
 0x19f   :  { %s243_s30 = sand.u32 2147483648, %s1266_s26  ;;  %p1367_p8 = scmp.lt.f32.partialorder %s245_s28, 2.1474836e+09 }
 0x1a0   :  { %s241_s29 = scvt.s32.f32 %s240_s27 }
 0x1a2   :  { %s242_s2 = sand.u32 2147483647, %s241_s29 }
 0x1a3   :  { %s244_s4 = sor.u32 %s243_s30, %s242_s2 }
 0x1a4   :  { %s2927_s4 = smov (!%p1367_p8, %s244_s4), %s1266_s26 }
 0x1a5   :  { %s248_s5 = ssub.f32 0.0, %s2927_s4 }
 0x1a7   :  { %v1466_v54 = vstv %s248_s5 }
 0x1a8   :  { %2690 = vst [vmem:[#allocation16_spill] sm:$0xff] %v1466_v54  ;;  %v1470_v22 = vadd.f32 %v1466_v54, %v1200_v16  ;;  %v1474_v27 = vadd.f32 %v1466_v54, %v1204_v20  ;;  %v1478_v39 = vadd.f32 %v1466_v54, %v1208_v24  ;;  %v1482_v44 = vadd.f32 %v1466_v54, %v1212_v28 }
 0x1a9   :  { %v1486_v19 = vadd.f32 %v1466_v54, %v1216_v2  ;;  %v1490_v16 = vadd.f32 %v1466_v54, %v1220_v0  ;;  %v1494_v20 = vadd.f32 %v1466_v54, %v1224_v1  ;;  %v1498_v24 = vadd.f32 %v1466_v54, %v1228_v3 }
 0x1aa   :  { %v1502_v28 = vadd.f32 %v1466_v54, %v1232_v59  ;;  %v1506_v2 = vadd.f32 %v1466_v54, %v1236_v4  ;;  %v1510_v0 = vadd.f32 %v1466_v54, %v1240_v5  ;;  %v1514_v1 = vadd.f32 %v1466_v54, %v1244_v6 }
 0x1ab   :  { %v1518_v3 = vadd.f32 %v1466_v54, %v1248_v38  ;;  %v1522_v59 = vadd.f32 %v1466_v54, %v1252_v36  ;;  %v1526_v4 = vadd.f32 %v1466_v54, %v1256_v12  ;;  %v1530_v5 = vadd.f32 %v1466_v54, %v1260_v48 }
 0x1ac   :  { %v1534_v6 = vadd.f32 %v1466_v54, %v2691_v53  ;;  %v1538_v38 = vadd.f32 %v1466_v54, %v1270_v15  ;;  %v1542_v36 = vadd.f32 %v1466_v54, %v1274_v30  ;;  %v1546_v12 = vadd.f32 %v1466_v54, %v1278_v45 }
 0x1ad   :  { %v1550_v48 = vadd.f32 %v1466_v54, %v1282_v8  ;;  %v1554_v53 = vadd.f32 %v1466_v54, %v1286_v62  ;;  %v1558_v15 = vadd.f32 %v1466_v54, %v1290_v63  ;;  %v1562_v30 = vadd.f32 %v1466_v54, %v1294_v21 }
 0x1ae   :  { %v1566_v45 = vadd.f32 %v1466_v54, %v1298_v31  ;;  %v1570_v8 = vadd.f32 %v1466_v54, %v1303_v11  ;;  %v1574_v62 = vadd.f32 %v1466_v54, %v1307_v7  ;;  %v1578_v63 = vadd.f32 %v1466_v54, %v1311_v42 }
 0x1af   :  { %v1582_v21 = vadd.f32 %v1466_v54, %v1315_v43  ;;  %v1586_v31 = vadd.f32 %v1466_v54, %v1320_v46  ;;  %v1590_v11 = vadd.f32 %v1466_v54, %v1324_v47  ;;  %v1594_v7 = vadd.f32 %v1466_v54, %v1328_v51 }
 0x1b0   :  { %v1598_v42 = vadd.f32 %v1466_v54, %v1332_v52  ;;  %v1602_v43 = vadd.f32 %v1466_v54, %v1336_v55  ;;  %v1606_v46 = vadd.f32 %v1466_v54, %v1340_v56  ;;  %v1610_v47 = vadd.f32 %v1466_v54, %v1344_v60 }
 0x1b1   :  { %v1614_v51 = vadd.f32 %v1466_v54, %v1348_v61  ;;  %v1618_v52 = vadd.f32 %v1466_v54, %v1353_v9  ;;  %v1622_v55 = vadd.f32 %v1466_v54, %v1357_v10  ;;  %v1626_v56 = vadd.f32 %v1466_v54, %v1361_v17 }
 0x1b2   :  { %v1630_v60 = vadd.f32 %v1466_v54, %v1365_v18  ;;  %v1634_v61 = vadd.f32 %v1466_v54, %v1373_v23  ;;  %v1638_v9 = vadd.f32 %v1466_v54, %v1377_v26  ;;  %v1642_v10 = vadd.f32 %v1466_v54, %v1381_v32 }
 0x1b3   :  { %2692 = vst [vmem:[#allocation17_spill] sm:$0xff] %v1618_v52  ;;  %2693 = vst [vmem:[#allocation18_spill] sm:$0xff] %v1622_v55  ;;  %v1646_v17 = vadd.f32 %v1466_v54, %v1385_v35  ;;  %v1650_v18 = vadd.f32 %v1466_v54, %v1389_v40  ;;  %v1654_v23 = vadd.f32 %v1466_v54, %v1393_v41 }
 0x1b4   :  { %2694 = vst [vmem:[#allocation19_spill] sm:$0xff] %v1626_v56  ;;  %2695 = vst [vmem:[#allocation20_spill] sm:$0xff] %v1630_v60  ;;  %v1658_v26 = vadd.f32 %v1466_v54, %v1397_v49  ;;  %v1662_v32 = vadd.f32 %v1466_v54, %v1401_v50  ;;  %v1666_v35 = vadd.f32 %v1466_v54, %v1408_v57 }
 0x1b5   :  { %2696 = vst [vmem:[#allocation21_spill] sm:$0xff] %v1634_v61  ;;  %v1670_v40 = vadd.f32 %v1466_v54, %v1412_v58  ;;  %v1674_v41 = vadd.f32 %v1466_v54, %v1416_v13  ;;  %v1678_v49 = vadd.f32 %v1466_v54, %v1420_v14 }
 0x1b6   :  { %2697 = vst [vmem:[#allocation22_spill] sm:$0xff] %v1658_v26  ;;  %2698 = vst [vmem:[#allocation23_spill] sm:$0xff] %v1662_v32  ;;  %v2703_v26 = vld [vmem:[#allocation9_spill] sm:$0xff]  ;;  %v2704_v32 = vld [vmem:[#allocation11_spill] sm:$0xff] }
 0x1b7   :  { %2699 = vst [vmem:[#allocation24_spill] sm:$0xff] %v1666_v35  ;;  %2700 = vst [vmem:[#allocation25_spill] sm:$0xff] %v1670_v40  ;;  %v1682_v50 = vadd.f32 %v1466_v54, %v2703_v26  ;;  %v1686_v57 = vadd.f32 %v1466_v54, %v2704_v32  ;;  %v2706_v35 = vld [vmem:[#allocation12_spill] sm:$0xff]  ;;  %v2707_v40 = vld [vmem:[#allocation13_spill] sm:$0xff]  ;;  %v1706_v32 = vadd.f32 %v1466_v54, %v1448_v33 }
 0x1b8   :  { %2701 = vst [vmem:[#allocation26_spill] sm:$0xff] %v1674_v41  ;;  %2702 = vst [vmem:[#allocation27_spill] sm:$0xff] %v1678_v49  ;;  %v1690_v58 = vadd.f32 %v1466_v54, %v2706_v35  ;;  %v1694_v13 = vadd.f32 %v1466_v54, %v2707_v40  ;;  %v2708_v41 = vld [vmem:[#allocation14_spill] sm:$0xff]  ;;  %v2709_v49 = vld [vmem:[#allocation15_spill] sm:$0xff]  ;;  %v1710_v35 = vadd.f32 %v1466_v54, %v1452_v34 }
 0x1b9   :  { %2705 = vst [vmem:[#allocation28_spill] sm:$0xff] %v1686_v57  ;;  %v1698_v14 = vadd.f32 %v1466_v54, %v2708_v41  ;;  %v1702_v26 = vadd.f32 %v1466_v54, %v2709_v49  ;;  %2711 = vst [vmem:[#allocation10_spill] sm:$0xff] %v1706_v32  ;;  %v1714_v40 = vadd.f32 %v1466_v54, %v1456_v29  ;;  %v2722_v52 = vmov %v1706_v32 }
 0x1ba   :  { %2712 = vst [vmem:[#allocation9_spill] sm:$0xff] %v1710_v35  ;;  %v1718_v41 = vadd.f32 %v1466_v54, %v1460_v25  ;;  %v1722_v49 = vadd.f32 %v1466_v54, %v1464_v37  ;;  %v2723_v55 = vmov %v1710_v35  ;;  %v2726_v35 = vround.rtne.f32 %v1470_v22  ;;  %v2773_v34 = vld [vmem:[#allocation17_spill] sm:$0xff] }
 0x1bb   :  { %2710 = vst [vmem:[#allocation29_spill] sm:$0xff] %v1702_v26  ;;  %2713 = vst [vmem:[#allocation11_spill] sm:$0xff] %v1714_v40  ;;  %v2721_v54 = vmov %v1702_v26  ;;  %v2724_v56 = vmov %v1714_v40  ;;  %v2727_v40 = vround.rtne.f32 %v1474_v27  ;;  %v2729_v26 = vround.rtne.f32 %v1482_v44 }
 0x1bc   :  { %2714 = vst [vmem:[#allocation12_spill] sm:$0xff] %v1718_v41  ;;  %v2725_v60 = vmov %v1718_v41  ;;  %v1790_v57 = vmax.f32 %v2726_v35, 0.0  ;;  %v2728_v41 = vround.rtne.f32 %v1478_v39  ;;  %v2730_v32 = vround.rtne.f32 %v1486_v19 }
 0x1bd   :  { %v1794_v29 = vmax.f32 %v2727_v40, 0.0  ;;  %v1802_v37 = vmax.f32 %v2729_v26, 0.0  ;;  %v2731_v22 = vround.rtne.f32 %v1490_v16  ;;  %v2732_v27 = vround.rtne.f32 %v1494_v20 }
 0x1be   :  { %v1798_v25 = vmax.f32 %v2728_v41, 0.0  ;;  %v1806_v33 = vmax.f32 %v2730_v32, 0.0  ;;  %v2733_v39 = vround.rtne.f32 %v1498_v24  ;;  %v2734_v44 = vround.rtne.f32 %v1502_v28 }
 0x1bf   :  { %v2720_v61 = vld [vmem:[#allocation27_spill] sm:$0xff]  ;;  %v1810_v35 = vmax.f32 %v2731_v22, 0.0  ;;  %v1814_v40 = vmax.f32 %v2732_v27, 0.0  ;;  %v2735_v19 = vround.rtne.f32 %v1506_v2  ;;  %v2736_v16 = vround.rtne.f32 %v1510_v0 }
 0x1c0   :  { %v1818_v41 = vmax.f32 %v2733_v39, 0.0  ;;  %v1822_v26 = vmax.f32 %v2734_v44, 0.0  ;;  %v2737_v20 = vround.rtne.f32 %v1514_v1  ;;  %v2738_v24 = vround.rtne.f32 %v1518_v3 }
 0x1c1   :  { %v1826_v32 = vmax.f32 %v2735_v19, 0.0  ;;  %v1830_v22 = vmax.f32 %v2736_v16, 0.0  ;;  %v2739_v28 = vround.rtne.f32 %v1522_v59  ;;  %v2740_v2 = vround.rtne.f32 %v1526_v4 }
 0x1c2   :  { %v1834_v27 = vmax.f32 %v2737_v20, 0.0  ;;  %v1838_v39 = vmax.f32 %v2738_v24, 0.0  ;;  %v2741_v0 = vround.rtne.f32 %v1530_v5  ;;  %v2742_v1 = vround.rtne.f32 %v1534_v6 }
 0x1c3   :  { %v1842_v44 = vmax.f32 %v2739_v28, 0.0  ;;  %v1846_v19 = vmax.f32 %v2740_v2, 0.0  ;;  %v2743_v3 = vround.rtne.f32 %v1538_v38  ;;  %v2744_v59 = vround.rtne.f32 %v1542_v36 }
 0x1c4   :  { %v1850_v16 = vmax.f32 %v2741_v0, 0.0  ;;  %v1854_v20 = vmax.f32 %v2742_v1, 0.0  ;;  %v2745_v4 = vround.rtne.f32 %v1546_v12  ;;  %v2746_v5 = vround.rtne.f32 %v1550_v48 }
 0x1c5   :  { %v1858_v24 = vmax.f32 %v2743_v3, 0.0  ;;  %v1862_v28 = vmax.f32 %v2744_v59, 0.0  ;;  %v2747_v6 = vround.rtne.f32 %v1554_v53  ;;  %v2749_v38 = vround.rtne.f32 %v1558_v15 }
 0x1c6   :  { %v1866_v2 = vmax.f32 %v2745_v4, 0.0  ;;  %v1870_v0 = vmax.f32 %v2746_v5, 0.0  ;;  %v2751_v36 = vround.rtne.f32 %v1562_v30  ;;  %v2753_v12 = vround.rtne.f32 %v1566_v45 }
 0x1c7   :  { %v1874_v1 = vmax.f32 %v2747_v6, 0.0  ;;  %v1878_v3 = vmax.f32 %v2749_v38, 0.0  ;;  %v2755_v48 = vround.rtne.f32 %v1570_v8  ;;  %v2756_v53 = vround.rtne.f32 %v1574_v62 }
 0x1c8   :  { %v1882_v59 = vmax.f32 %v2751_v36, 0.0  ;;  %v1886_v4 = vmax.f32 %v2753_v12, 0.0  ;;  %v2757_v15 = vround.rtne.f32 %v1578_v63  ;;  %v2758_v30 = vround.rtne.f32 %v1582_v21 }
 0x1c9   :  { %2748 = vst [vmem:[#allocation13_spill] sm:$0xff] %v1874_v1  ;;  %2750 = vst [vmem:[#allocation14_spill] sm:$0xff] %v1878_v3  ;;  %v1890_v5 = vmax.f32 %v2755_v48, 0.0  ;;  %v1894_v6 = vmax.f32 %v2756_v53, 0.0  ;;  %v2759_v45 = vround.rtne.f32 %v1586_v31  ;;  %v2760_v8 = vround.rtne.f32 %v1590_v11 }
 0x1ca   :  { %2752 = vst [vmem:[#allocation15_spill] sm:$0xff] %v1882_v59  ;;  %2754 = vst [vmem:[#allocation27_spill] sm:$0xff] %v1886_v4  ;;  %v1898_v38 = vmax.f32 %v2757_v15, 0.0  ;;  %v1902_v36 = vmax.f32 %v2758_v30, 0.0  ;;  %v2762_v62 = vround.rtne.f32 %v1594_v7  ;;  %v2764_v63 = vround.rtne.f32 %v1598_v42 }
 0x1cb   :  { %v1906_v12 = vmax.f32 %v2759_v45, 0.0  ;;  %v1910_v48 = vmax.f32 %v2760_v8, 0.0  ;;  %v2766_v21 = vround.rtne.f32 %v1602_v43  ;;  %v2768_v31 = vround.rtne.f32 %v1606_v46 }
 0x1cc   :  { %v1914_v53 = vmax.f32 %v2762_v62, 0.0  ;;  %v1918_v15 = vmax.f32 %v2764_v63, 0.0  ;;  %v2770_v11 = vround.rtne.f32 %v1610_v47  ;;  %v2772_v7 = vround.rtne.f32 %v1614_v51 }
 0x1cd   :  { %2761 = vst [vmem:[#allocation29_spill] sm:$0xff] %v1910_v48  ;;  %v1922_v30 = vmax.f32 %v2766_v21, 0.0  ;;  %v1926_v45 = vmax.f32 %v2768_v31, 0.0  ;;  %v2774_v42 = vround.rtne.f32 %v2773_v34  ;;  %v2785_v34 = vround.rtne.f32 %v1638_v9 }
 0x1ce   :  { %2763 = vst [vmem:[#allocation10_spill] sm:$0xff] %v1914_v53  ;;  %2765 = vst [vmem:[#allocation9_spill] sm:$0xff] %v1918_v15  ;;  %v1930_v8 = vmax.f32 %v2770_v11, 0.0  ;;  %v1934_v62 = vmax.f32 %v2772_v7, 0.0  ;;  %v2776_v15 = vld [vmem:[#allocation18_spill] sm:$0xff] }
 0x1cf   :  { %2767 = vst [vmem:[#allocation11_spill] sm:$0xff] %v1922_v30  ;;  %2769 = vst [vmem:[#allocation12_spill] sm:$0xff] %v1926_v45  ;;  %v1938_v63 = vmax.f32 %v2774_v42, 0.0  ;;  %v2777_v43 = vround.rtne.f32 %v2776_v15  ;;  %v2778_v30 = vld [vmem:[#allocation19_spill] sm:$0xff]  ;;  %v2780_v45 = vld [vmem:[#allocation20_spill] sm:$0xff]  ;;  %v1958_v42 = vmax.f32 %v2785_v34, 0.0  ;;  %v2787_v15 = vround.rtne.f32 %v1642_v10 }
 0x1d0   :  { %2771 = vst [vmem:[#allocation30_spill] sm:$0xff] %v1930_v8  ;;  %v2779_v46 = vround.rtne.f32 %v2778_v30  ;;  %v2781_v47 = vround.rtne.f32 %v2780_v45  ;;  %v2782_v8 = vld [vmem:[#allocation21_spill] sm:$0xff]  ;;  %v2789_v30 = vround.rtne.f32 %v1646_v17  ;;  %v2791_v45 = vround.rtne.f32 %v1650_v18 }
 0x1d1   :  { %2775 = vst [vmem:[#allocation17_spill] sm:$0xff] %v1938_v63  ;;  %v1942_v21 = vmax.f32 %v2777_v43, 0.0  ;;  %v2783_v51 = vround.rtne.f32 %v2782_v8  ;;  %2786 = vst [vmem:[#allocation19_spill] sm:$0xff] %v1958_v42  ;;  %v1962_v43 = vmax.f32 %v2787_v15, 0.0  ;;  %v2793_v8 = vround.rtne.f32 %v1654_v23  ;;  %v2796_v42 = vld [vmem:[#allocation23_spill] sm:$0xff] }
 0x1d2   :  { %v1946_v31 = vmax.f32 %v2779_v46, 0.0  ;;  %v1950_v11 = vmax.f32 %v2781_v47, 0.0  ;;  %v1966_v46 = vmax.f32 %v2789_v30, 0.0  ;;  %v1970_v47 = vmax.f32 %v2791_v45, 0.0 }
 0x1d3   :  { %v1954_v7 = vmax.f32 %v2783_v51, 0.0  ;;  %2788 = vst [vmem:[#allocation20_spill] sm:$0xff] %v1962_v43  ;;  %v1974_v51 = vmax.f32 %v2793_v8, 0.0  ;;  %v2797_v10 = vround.rtne.f32 %v2796_v42  ;;  %v2799_v43 = vld [vmem:[#allocation24_spill] sm:$0xff]  ;;  %v2806_v42 = vround.rtne.f32 %v1682_v50 }
 0x1d4   :  { %2790 = vst [vmem:[#allocation21_spill] sm:$0xff] %v1966_v46  ;;  %2792 = vst [vmem:[#allocation31_spill] sm:$0xff] %v1970_v47  ;;  %v2800_v17 = vround.rtne.f32 %v2799_v43  ;;  %v2801_v46 = vld [vmem:[#allocation25_spill] sm:$0xff]  ;;  %v2803_v47 = vld [vmem:[#allocation26_spill] sm:$0xff]  ;;  %v2813_v50 = vround.rtne.f32 %v2721_v54  ;;  %v2818_v54 = vround.rtne.f32 %v1722_v49 }
 0x1d5   :  { %2784 = vst [vmem:[#allocation18_spill] sm:$0xff] %v1954_v7  ;;  %v2794_v7 = vld [vmem:[#allocation22_spill] sm:$0xff]  ;;  %v1982_v15 = vmax.f32 %v2797_v10, 0.0  ;;  %v2802_v18 = vround.rtne.f32 %v2801_v46  ;;  %v2804_v23 = vround.rtne.f32 %v2803_v47  ;;  %v2002_v10 = vmax.f32 %v2806_v42, 0.0 }
 0x1d6   :  { %v2795_v9 = vround.rtne.f32 %v2794_v7  ;;  %v1986_v30 = vmax.f32 %v2800_v17, 0.0  ;;  %v2805_v7 = vround.rtne.f32 %v2720_v61  ;;  %v2810_v46 = vround.rtne.f32 %v1690_v58  ;;  %v2855_v49 = vld [vmem:[#allocation14_spill] sm:$0xff] }
 0x1d7   :  { %2798 = vst [vmem:[#allocation22_spill] sm:$0xff] %v1982_v15  ;;  %v1990_v45 = vmax.f32 %v2802_v18, 0.0  ;;  %v1994_v8 = vmax.f32 %v2804_v23, 0.0  ;;  %2807 = vst [vmem:[#allocation23_spill] sm:$0xff] %v2002_v10  ;;  %v2808_v15 = vld [vmem:[#allocation28_spill] sm:$0xff]  ;;  %v2811_v47 = vround.rtne.f32 %v1694_v13  ;;  %v2812_v61 = vround.rtne.f32 %v1698_v14  ;;  %v2822_v4 = vld [vmem:[#allocation30_spill] sm:$0xff] }
 0x1d8   :  { %v1978_v34 = vmax.f32 %v2795_v9, 0.0  ;;  %v1998_v9 = vmax.f32 %v2805_v7, 0.0  ;;  %v2809_v43 = vround.rtne.f32 %v2808_v15  ;;  %v2010_v18 = vmax.f32 %v2810_v46, 0.0  ;;  %v2824_v53 = vld [vmem:[#allocation19_spill] sm:$0xff]  ;;  %v2829_v10 = vld [vmem:[#allocation16_spill] sm:$0xff] }
 0x1d9   :  { %v2014_v23 = vmax.f32 %v2811_v47, 0.0  ;;  %v2018_v7 = vmax.f32 %v2812_v61, 0.0  ;;  %v2022_v42 = vmax.f32 %v2813_v50, 0.0  ;;  %v2814_v15 = vround.rtne.f32 %v2722_v52 }
 0x1da   :  { %v2006_v17 = vmax.f32 %v2809_v43, 0.0  ;;  %v2815_v58 = vround.rtne.f32 %v2723_v55  ;;  %v2816_v13 = vround.rtne.f32 %v2724_v56  ;;  %v2817_v14 = vround.rtne.f32 %v2725_v60  ;;  %v2825_v1 = vld [vmem:[#allocation20_spill] sm:$0xff] }
 0x1db   :  { %v2026_v43 = vmax.f32 %v2814_v15, 0.0  ;;  %v2042_v50 = vmax.f32 %v2818_v54, 0.0  ;;  %v2826_v3 = vld [vmem:[#allocation21_spill] sm:$0xff]  ;;  %v2827_v59 = vld [vmem:[#allocation31_spill] sm:$0xff]  ;;  %v2830_v56 = vmin.f32 %v1790_v57, 255.0  ;;  %v2832_v54 = vmin.f32 %v1798_v25, 255.0 }
 0x1dc   :  { %v2030_v46 = vmax.f32 %v2815_v58, 0.0  ;;  %v2034_v47 = vmax.f32 %v2816_v13, 0.0  ;;  %v2038_v61 = vmax.f32 %v2817_v14, 0.0  ;;  %v2823_v48 = vld [vmem:[#allocation18_spill] sm:$0xff]  ;;  %v2831_v14 = vmin.f32 %v1794_v29, 255.0  ;;  %v2853_v58 = vld [vmem:[#allocation13_spill] sm:$0xff] }
 0x1dd   :  { %v2111_v13 = vsub.f32 %v2830_v56, %v2829_v10  ;;  %v2121_v52 = vsub.f32 %v2832_v54, %v2829_v10  ;;  %v2833_v55 = vmin.f32 %v1802_v37, 255.0  ;;  %v2834_v57 = vmin.f32 %v1806_v33, 255.0 }
 0x1de   :  { %v2828_v63 = vld [vmem:[#allocation22_spill] sm:$0xff]  ;;  %v2116_v60 = vsub.f32 %v2831_v14, %v2829_v10  ;;  %v2835_v29 = vmin.f32 %v1810_v35, 255.0  ;;  %v2836_v25 = vmin.f32 %v1814_v40, 255.0  ;;  %v2837_v37 = vmin.f32 %v1818_v41, 255.0 }
 0x1df   :  { %v2126_v15 = vsub.f32 %v2833_v55, %v2829_v10  ;;  %v2131_v56 = vsub.f32 %v2834_v57, %v2829_v10  ;;  %v2838_v33 = vmin.f32 %v1822_v26, 255.0  ;;  %v2839_v35 = vmin.f32 %v1826_v32, 255.0 }
 0x1e0   :  { %v2136_v14 = vsub.f32 %v2835_v29, %v2829_v10  ;;  %v2141_v54 = vsub.f32 %v2836_v25, %v2829_v10  ;;  %v2146_v55 = vsub.f32 %v2837_v37, %v2829_v10  ;;  %v2840_v40 = vmin.f32 %v1830_v22, 255.0 }
 0x1e1   :  { %v2151_v57 = vsub.f32 %v2838_v33, %v2829_v10  ;;  %v2156_v29 = vsub.f32 %v2839_v35, %v2829_v10  ;;  %v2841_v41 = vmin.f32 %v1834_v27, 255.0  ;;  %v2842_v26 = vmin.f32 %v1838_v39, 255.0 }
 0x1e2   :  { %v2161_v25 = vsub.f32 %v2840_v40, %v2829_v10  ;;  %v2843_v32 = vmin.f32 %v1842_v44, 255.0  ;;  %v2844_v22 = vmin.f32 %v1846_v19, 255.0  ;;  %v2845_v27 = vmin.f32 %v1850_v16, 255.0 }
 0x1e3   :  { %v2166_v37 = vsub.f32 %v2841_v41, %v2829_v10  ;;  %v2171_v33 = vsub.f32 %v2842_v26, %v2829_v10  ;;  %v2846_v39 = vmin.f32 %v1854_v20, 255.0  ;;  %v2847_v44 = vmin.f32 %v1858_v24, 255.0 }
 0x1e4   :  { %v2176_v35 = vsub.f32 %v2843_v32, %v2829_v10  ;;  %v2181_v40 = vsub.f32 %v2844_v22, %v2829_v10  ;;  %v2186_v41 = vsub.f32 %v2845_v27, %v2829_v10  ;;  %v2848_v19 = vmin.f32 %v1862_v28, 255.0 }
 0x1e5   :  { %v2191_v26 = vsub.f32 %v2846_v39, %v2829_v10  ;;  %v2196_v32 = vsub.f32 %v2847_v44, %v2829_v10  ;;  %v2850_v16 = vmin.f32 %v1866_v2, 255.0  ;;  %v2852_v20 = vmin.f32 %v1870_v0, 255.0 }
 0x1e6   :  { %v2201_v22 = vsub.f32 %v2848_v19, %v2829_v10  ;;  %v2854_v24 = vmin.f32 %v2853_v58, 255.0  ;;  %v2856_v28 = vmin.f32 %v2855_v49, 255.0  ;;  %v2861_v58 = vmin.f32 %v1890_v5, 255.0 }
 0x1e7   :  { %v2206_v27 = vsub.f32 %v2850_v16, %v2829_v10  ;;  %v2211_v39 = vsub.f32 %v2852_v20, %v2829_v10  ;;  %v2863_v49 = vmin.f32 %v1894_v6, 255.0  ;;  %v2869_v5 = vmin.f32 %v1906_v12, 255.0 }
 0x1e8   :  { %2849 = vst [vmem:[#allocation24_spill] sm:$0xff] %v2201_v22  ;;  %v2216_v44 = vsub.f32 %v2854_v24, %v2829_v10  ;;  %v2221_v19 = vsub.f32 %v2856_v28, %v2829_v10  ;;  %v2857_v22 = vld [vmem:[#allocation15_spill] sm:$0xff]  ;;  %v2236_v24 = vsub.f32 %v2861_v58, %v2829_v10 }
 0x1e9   :  { %2851 = vst [vmem:[#allocation25_spill] sm:$0xff] %v2206_v27  ;;  %v2858_v2 = vmin.f32 %v2857_v22, 255.0  ;;  %v2859_v27 = vld [vmem:[#allocation27_spill] sm:$0xff]  ;;  %v2241_v28 = vsub.f32 %v2863_v49, %v2829_v10  ;;  %v2865_v22 = vmin.f32 %v1898_v38, 255.0  ;;  %v2256_v58 = vsub.f32 %v2869_v5, %v2829_v10 }
 0x1ea   :  { %v2860_v0 = vmin.f32 %v2859_v27, 255.0  ;;  %2862 = vst [vmem:[#allocation26_spill] sm:$0xff] %v2236_v24  ;;  %v2867_v27 = vmin.f32 %v1902_v36, 255.0  ;;  %v2871_v24 = vld [vmem:[#allocation29_spill] sm:$0xff] }
 0x1eb   :  { %v2226_v16 = vsub.f32 %v2858_v2, %v2829_v10  ;;  %2864 = vst [vmem:[#allocation28_spill] sm:$0xff] %v2241_v28  ;;  %v2246_v2 = vsub.f32 %v2865_v22, %v2829_v10  ;;  %2870 = vst [vmem:[#allocation19_spill] sm:$0xff] %v2256_v58  ;;  %v2872_v6 = vmin.f32 %v2871_v24, 255.0  ;;  %v2873_v28 = vld [vmem:[#allocation10_spill] sm:$0xff]  ;;  %v2880_v58 = vld [vmem:[#allocation12_spill] sm:$0xff] }
 0x1ec   :  { %v2231_v20 = vsub.f32 %v2860_v0, %v2829_v10  ;;  %v2251_v0 = vsub.f32 %v2867_v27, %v2829_v10  ;;  %v2874_v38 = vmin.f32 %v2873_v28, 255.0  ;;  %v2881_v24 = vmin.f32 %v2880_v58, 255.0 }
 0x1ed   :  { %2866 = vst [vmem:[#allocation30_spill] sm:$0xff] %v2246_v2  ;;  %v2261_v49 = vsub.f32 %v2872_v6, %v2829_v10  ;;  %v2875_v2 = vld [vmem:[#allocation9_spill] sm:$0xff]  ;;  %v2882_v28 = vmin.f32 %v2822_v4, 255.0  ;;  %v2886_v58 = vmin.f32 %v1942_v21, 255.0  ;;  %v2887_v4 = vmin.f32 %v1946_v31, 255.0 }
 0x1ee   :  { %2868 = vst [vmem:[#allocation18_spill] sm:$0xff] %v2251_v0  ;;  %v2266_v22 = vsub.f32 %v2874_v38, %v2829_v10  ;;  %v2876_v36 = vmin.f32 %v2875_v2, 255.0  ;;  %v2878_v0 = vld [vmem:[#allocation11_spill] sm:$0xff]  ;;  %v2281_v6 = vsub.f32 %v2881_v24, %v2829_v10  ;;  %v2883_v2 = vmin.f32 %v1934_v62, 255.0 }
 0x1ef   :  { %v2879_v12 = vmin.f32 %v2878_v0, 255.0  ;;  %v2286_v38 = vsub.f32 %v2882_v28, %v2829_v10  ;;  %v2301_v24 = vsub.f32 %v2886_v58, %v2829_v10  ;;  %v2306_v28 = vsub.f32 %v2887_v4, %v2829_v10 }
 0x1f0   :  { %v2271_v27 = vsub.f32 %v2876_v36, %v2829_v10  ;;  %v2291_v36 = vsub.f32 %v2883_v2, %v2829_v10  ;;  %v2888_v62 = vmin.f32 %v1950_v11, 255.0  ;;  %v2890_v21 = vmin.f32 %v2824_v53, 255.0 }
 0x1f1   :  { %v2276_v5 = vsub.f32 %v2879_v12, %v2829_v10  ;;  %v2891_v31 = vmin.f32 %v2825_v1, 255.0  ;;  %v2892_v11 = vmin.f32 %v2826_v3, 255.0  ;;  %v2894_v53 = vmin.f32 %v1974_v51, 255.0 }
 0x1f2   :  { %2877 = vst [vmem:[#allocation20_spill] sm:$0xff] %v2271_v27  ;;  %v2884_v27 = vld [vmem:[#allocation17_spill] sm:$0xff]  ;;  %v2311_v2 = vsub.f32 %v2888_v62, %v2829_v10  ;;  %v2321_v58 = vsub.f32 %v2890_v21, %v2829_v10  ;;  %v2895_v1 = vmin.f32 %v1978_v34, 255.0  ;;  %v2896_v3 = vmin.f32 %v2828_v63, 255.0 }
 0x1f3   :  { %v2885_v0 = vmin.f32 %v2884_v27, 255.0  ;;  %v2889_v27 = vmin.f32 %v2823_v48, 255.0  ;;  %v2326_v4 = vsub.f32 %v2891_v31, %v2829_v10  ;;  %v2331_v62 = vsub.f32 %v2892_v11, %v2829_v10 }
 0x1f4   :  { %v2893_v48 = vmin.f32 %v2827_v59, 255.0  ;;  %v2341_v21 = vsub.f32 %v2894_v53, %v2829_v10  ;;  %v2346_v31 = vsub.f32 %v2895_v1, %v2829_v10  ;;  %v2351_v11 = vsub.f32 %v2896_v3, %v2829_v10 }
 0x1f5   :  { %v2296_v12 = vsub.f32 %v2885_v0, %v2829_v10  ;;  %v2316_v0 = vsub.f32 %v2889_v27, %v2829_v10  ;;  %v2898_v59 = vmin.f32 %v1986_v30, 255.0  ;;  %v2899_v51 = vmin.f32 %v1990_v45, 255.0 }
 0x1f6   :  { %v2336_v27 = vsub.f32 %v2893_v48, %v2829_v10  ;;  %2897 = vst [vmem:[#allocation21_spill] sm:$0xff] %v2351_v11  ;;  %v2900_v34 = vmin.f32 %v1994_v8, 255.0  ;;  %v2901_v63 = vmin.f32 %v1998_v9, 255.0  ;;  %v2902_v11 = vld [vmem:[#allocation23_spill] sm:$0xff]  ;;  %v2904_v45 = vmin.f32 %v2006_v17, 255.0 }
 0x1f7   :  { %v2356_v48 = vsub.f32 %v2898_v59, %v2829_v10  ;;  %v2361_v53 = vsub.f32 %v2899_v51, %v2829_v10  ;;  %v2903_v30 = vmin.f32 %v2902_v11, 255.0  ;;  %v2905_v8 = vmin.f32 %v2010_v18, 255.0 }
 0x1f8   :  { %v2366_v1 = vsub.f32 %v2900_v34, %v2829_v10  ;;  %v2371_v3 = vsub.f32 %v2901_v63, %v2829_v10  ;;  %v2381_v51 = vsub.f32 %v2904_v45, %v2829_v10  ;;  %v2906_v9 = vmin.f32 %v2014_v23, 255.0 }
 0x1f9   :  { %v2376_v59 = vsub.f32 %v2903_v30, %v2829_v10  ;;  %v2386_v34 = vsub.f32 %v2905_v8, %v2829_v10  ;;  %v2907_v11 = vmin.f32 %v2018_v7, 255.0  ;;  %v2908_v17 = vmin.f32 %v2022_v42, 255.0 }
 0x1fa   :  { %v2391_v63 = vsub.f32 %v2906_v9, %v2829_v10  ;;  %v2909_v18 = vmin.f32 %v2026_v43, 255.0  ;;  %v2911_v23 = vmin.f32 %v2030_v46, 255.0  ;;  %v2912_v7 = vmin.f32 %v2034_v47, 255.0 }
 0x1fb   :  { %v2396_v30 = vsub.f32 %v2907_v11, %v2829_v10  ;;  %v2401_v45 = vsub.f32 %v2908_v17, %v2829_v10  ;;  %v2913_v42 = vmin.f32 %v2038_v61, 255.0  ;;  %v2914_v43 = vmin.f32 %v2042_v50, 255.0 }
 0x1fc   :  { %v2406_v8 = vsub.f32 %v2909_v18, %v2829_v10  ;;  %v2411_v9 = vsub.f32 %v2911_v23, %v2829_v10  ;;  %v2416_v11 = vsub.f32 %v2912_v7, %v2829_v10 }
 0x1fd   :  { %v2421_v17 = vsub.f32 %v2913_v42, %v2829_v10  ;;  %v2426_v18 = vsub.f32 %v2914_v43, %v2829_v10 }
 0x1fe   :  { %2910 = vst [vmem:[#allocation31_spill] sm:$0xff] %v2406_v8  ;;  %v2915_v8 = vld [vmem:[#allocation8_spill] sm:$0xff] }
 0x1ff   :  { %v636_v46 = vmul.f32 %v2111_v13, %v2915_v8  ;;  %v637_v23 = vmul.f32 %v2116_v60, %v2915_v8  ;;  %v638_v47 = vmul.f32 %v2121_v52, %v2915_v8  ;;  %v639_v7 = vmul.f32 %v2126_v15, %v2915_v8 }
 0x200   :  { %v640_v61 = vmul.f32 %v2131_v56, %v2915_v8  ;;  %v641_v50 = vmul.f32 %v2136_v14, %v2915_v8  ;;  %v642_v10 = vmul.f32 %v2141_v54, %v2915_v8  ;;  %v643_v13 = vmul.f32 %v2146_v55, %v2915_v8 }
 0x201   :  { %v644_v60 = vmul.f32 %v2151_v57, %v2915_v8  ;;  %v645_v52 = vmul.f32 %v2156_v29, %v2915_v8  ;;  %v646_v15 = vmul.f32 %v2161_v25, %v2915_v8  ;;  %v647_v56 = vmul.f32 %v2166_v37, %v2915_v8  ;;  %700 = vst [vmem:[#allocation5] sm:$0xff] %v636_v46  ;;  %v2916_v37 = vld [vmem:[#allocation24_spill] sm:$0xff]  ;;  %v2918_v46 = vld [vmem:[#allocation26_spill] sm:$0xff] }
 0x202   :  { %701 = vst [vmem:[#allocation5 + $0x8] sm:$0xff] %v637_v23  ;;  %702 = vst [vmem:[#allocation5 + $0x10] sm:$0xff] %v638_v47  ;;  %v648_v14 = vmul.f32 %v2171_v33, %v2915_v8  ;;  %v649_v54 = vmul.f32 %v2176_v35, %v2915_v8  ;;  %v650_v55 = vmul.f32 %v2181_v40, %v2915_v8  ;;  %v2917_v35 = vld [vmem:[#allocation25_spill] sm:$0xff] }
 0x203   :  { %703 = vst [vmem:[#allocation5 + $0x18] sm:$0xff] %v639_v7  ;;  %v651_v57 = vmul.f32 %v2186_v41, %v2915_v8  ;;  %704 = vst [vmem:[#allocation5 + $0x20] sm:$0xff] %v640_v61  ;;  %v652_v29 = vmul.f32 %v2191_v26, %v2915_v8  ;;  %v653_v25 = vmul.f32 %v2196_v32, %v2915_v8  ;;  %v2922_v61 = vld [vmem:[#allocation19_spill] sm:$0xff] }
 0x204   :  { %705 = vst [vmem:[#allocation5 + $0x28] sm:$0xff] %v641_v50  ;;  %706 = vst [vmem:[#allocation5 + $0x30] sm:$0xff] %v642_v10  ;;  %v654_v33 = vmul.f32 %v2916_v37, %v2915_v8  ;;  %v655_v42 = vmul.f32 %v2917_v35, %v2915_v8  ;;  %v656_v40 = vmul.f32 %v2211_v39, %v2915_v8  ;;  %v2919_v39 = vld [vmem:[#allocation28_spill] sm:$0xff] }
 0x205   :  { %707 = vst [vmem:[#allocation5 + $0x38] sm:$0xff] %v643_v13  ;;  %708 = vst [vmem:[#allocation5 + $0x40] sm:$0xff] %v644_v60  ;;  %v657_v41 = vmul.f32 %v2216_v44, %v2915_v8  ;;  %v658_v26 = vmul.f32 %v2221_v19, %v2915_v8  ;;  %v659_v32 = vmul.f32 %v2226_v16, %v2915_v8  ;;  %v2920_v44 = vld [vmem:[#allocation30_spill] sm:$0xff]  ;;  %v2923_v13 = vld [vmem:[#allocation20_spill] sm:$0xff] }
 0x206   :  { %709 = vst [vmem:[#allocation5 + $0x48] sm:$0xff] %v645_v52  ;;  %710 = vst [vmem:[#allocation5 + $0x50] sm:$0xff] %v646_v15  ;;  %v660_v43 = vmul.f32 %v2231_v20, %v2915_v8  ;;  %v661_v23 = vmul.f32 %v2918_v46, %v2915_v8  ;;  %v662_v47 = vmul.f32 %v2919_v39, %v2915_v8  ;;  %v2921_v19 = vld [vmem:[#allocation18_spill] sm:$0xff] }
 0x207   :  { %711 = vst [vmem:[#allocation5 + $0x58] sm:$0xff] %v647_v56  ;;  %712 = vst [vmem:[#allocation5 + $0x60] sm:$0xff] %v648_v14  ;;  %v663_v7 = vmul.f32 %v2920_v44, %v2915_v8  ;;  %v664_v16 = vmul.f32 %v2921_v19, %v2915_v8  ;;  %v665_v50 = vmul.f32 %v2922_v61, %v2915_v8 }
 0x208   :  { %713 = vst [vmem:[#allocation5 + $0x68] sm:$0xff] %v649_v54  ;;  %714 = vst [vmem:[#allocation5 + $0x70] sm:$0xff] %v650_v55  ;;  %v666_v20 = vmul.f32 %v2261_v49, %v2915_v8  ;;  %v667_v10 = vmul.f32 %v2266_v22, %v2915_v8  ;;  %v668_v60 = vmul.f32 %v2923_v13, %v2915_v8 }
 0x209   :  { %715 = vst [vmem:[#allocation5 + $0x78] sm:$0xff] %v651_v57  ;;  %716 = vst [vmem:[#allocation5 + $0x80] sm:$0xff] %v652_v29  ;;  %v669_v52 = vmul.f32 %v2276_v5, %v2915_v8  ;;  %v670_v15 = vmul.f32 %v2281_v6, %v2915_v8  ;;  %v671_v56 = vmul.f32 %v2286_v38, %v2915_v8 }
 0x20a   :  { %717 = vst [vmem:[#allocation5 + $0x88] sm:$0xff] %v653_v25  ;;  %718 = vst [vmem:[#allocation5 + $0x90] sm:$0xff] %v654_v33  ;;  %v672_v49 = vmul.f32 %v2291_v36, %v2915_v8  ;;  %v673_v22 = vmul.f32 %v2296_v12, %v2915_v8  ;;  %v674_v14 = vmul.f32 %v2301_v24, %v2915_v8 }
 0x20b   :  { %719 = vst [vmem:[#allocation5 + $0x98] sm:$0xff] %v655_v42  ;;  %720 = vst [vmem:[#allocation5 + $0xa0] sm:$0xff] %v656_v40  ;;  %v675_v5 = vmul.f32 %v2306_v28, %v2915_v8  ;;  %v676_v6 = vmul.f32 %v2311_v2, %v2915_v8  ;;  %v677_v38 = vmul.f32 %v2316_v0, %v2915_v8 }
 0x20c   :  { %721 = vst [vmem:[#allocation5 + $0xa8] sm:$0xff] %v657_v41  ;;  %722 = vst [vmem:[#allocation5 + $0xb0] sm:$0xff] %v658_v26  ;;  %v678_v36 = vmul.f32 %v2321_v58, %v2915_v8  ;;  %v679_v12 = vmul.f32 %v2326_v4, %v2915_v8  ;;  %v680_v24 = vmul.f32 %v2331_v62, %v2915_v8  ;;  %v2924_v58 = vld [vmem:[#allocation21_spill] sm:$0xff] }
 0x20d   :  { %723 = vst [vmem:[#allocation5 + $0xb8] sm:$0xff] %v659_v32  ;;  %724 = vst [vmem:[#allocation5 + $0xc0] sm:$0xff] %v660_v43  ;;  %v681_v28 = vmul.f32 %v2336_v27, %v2915_v8  ;;  %v682_v2 = vmul.f32 %v2341_v21, %v2915_v8  ;;  %v683_v0 = vmul.f32 %v2346_v31, %v2915_v8 }
 0x20e   :  { %725 = vst [vmem:[#allocation5 + $0xc8] sm:$0xff] %v661_v23  ;;  %726 = vst [vmem:[#allocation5 + $0xd0] sm:$0xff] %v662_v47  ;;  %v684_v4 = vmul.f32 %v2924_v58, %v2915_v8  ;;  %v685_v54 = vmul.f32 %v2356_v48, %v2915_v8  ;;  %v686_v62 = vmul.f32 %v2361_v53, %v2915_v8 }
 0x20f   :  { %727 = vst [vmem:[#allocation5 + $0xd8] sm:$0xff] %v663_v7  ;;  %728 = vst [vmem:[#allocation5 + $0xe0] sm:$0xff] %v664_v16  ;;  %v687_v27 = vmul.f32 %v2366_v1, %v2915_v8  ;;  %v688_v21 = vmul.f32 %v2371_v3, %v2915_v8  ;;  %v689_v31 = vmul.f32 %v2376_v59, %v2915_v8  ;;  %v2925_v59 = vld [vmem:[#allocation31_spill] sm:$0xff] }
 0x210   :  { %729 = vst [vmem:[#allocation5 + $0xe8] sm:$0xff] %v665_v50  ;;  %730 = vst [vmem:[#allocation5 + $0xf0] sm:$0xff] %v666_v20  ;;  %v690_v48 = vmul.f32 %v2381_v51, %v2915_v8  ;;  %v691_v53 = vmul.f32 %v2386_v34, %v2915_v8  ;;  %v692_v1 = vmul.f32 %v2391_v63, %v2915_v8 }
 0x211   :  { %731 = vst [vmem:[#allocation5 + $0xf8] sm:$0xff] %v667_v10  ;;  %732 = vst [vmem:[#allocation5 + $0x100] sm:$0xff] %v668_v60  ;;  %v693_v55 = vmul.f32 %v2396_v30, %v2915_v8  ;;  %v694_v3 = vmul.f32 %v2401_v45, %v2915_v8  ;;  %v695_v57 = vmul.f32 %v2925_v59, %v2915_v8 }
 0x212   :  { %733 = vst [vmem:[#allocation5 + $0x108] sm:$0xff] %v669_v52  ;;  %734 = vst [vmem:[#allocation5 + $0x110] sm:$0xff] %v670_v15  ;;  %v696_v51 = vmul.f32 %v2411_v9, %v2915_v8  ;;  %v697_v34 = vmul.f32 %v2416_v11, %v2915_v8  ;;  %v698_v63 = vmul.f32 %v2421_v17, %v2915_v8 }
 0x213   :  { %735 = vst [vmem:[#allocation5 + $0x118] sm:$0xff] %v671_v56  ;;  %736 = vst [vmem:[#allocation5 + $0x120] sm:$0xff] %v672_v49  ;;  %v699_v30 = vmul.f32 %v2426_v18, %v2915_v8 }
 0x214   :  { %737 = vst [vmem:[#allocation5 + $0x128] sm:$0xff] %v673_v22  ;;  %738 = vst [vmem:[#allocation5 + $0x130] sm:$0xff] %v674_v14 }
 0x215   :  { %739 = vst [vmem:[#allocation5 + $0x138] sm:$0xff] %v675_v5  ;;  %740 = vst [vmem:[#allocation5 + $0x140] sm:$0xff] %v676_v6 }
 0x216   :  { %741 = vst [vmem:[#allocation5 + $0x148] sm:$0xff] %v677_v38  ;;  %742 = vst [vmem:[#allocation5 + $0x150] sm:$0xff] %v678_v36 }
 0x217   :  { %743 = vst [vmem:[#allocation5 + $0x158] sm:$0xff] %v679_v12  ;;  %744 = vst [vmem:[#allocation5 + $0x160] sm:$0xff] %v680_v24 }
 0x218   :  { %745 = vst [vmem:[#allocation5 + $0x168] sm:$0xff] %v681_v28  ;;  %746 = vst [vmem:[#allocation5 + $0x170] sm:$0xff] %v682_v2 }
 0x219   :  { %747 = vst [vmem:[#allocation5 + $0x178] sm:$0xff] %v683_v0  ;;  %748 = vst [vmem:[#allocation5 + $0x180] sm:$0xff] %v684_v4 }
 0x21a   :  { %749 = vst [vmem:[#allocation5 + $0x188] sm:$0xff] %v685_v54  ;;  %750 = vst [vmem:[#allocation5 + $0x190] sm:$0xff] %v686_v62 }
 0x21b   :  { %751 = vst [vmem:[#allocation5 + $0x198] sm:$0xff] %v687_v27  ;;  %752 = vst [vmem:[#allocation5 + $0x1a0] sm:$0xff] %v688_v21 }
 0x21c   :  { %753 = vst [vmem:[#allocation5 + $0x1a8] sm:$0xff] %v689_v31  ;;  %754 = vst [vmem:[#allocation5 + $0x1b0] sm:$0xff] %v690_v48 }
 0x21d   :  { %755 = vst [vmem:[#allocation5 + $0x1b8] sm:$0xff] %v691_v53  ;;  %756 = vst [vmem:[#allocation5 + $0x1c0] sm:$0xff] %v692_v1 }
 0x21e   :  { %757 = vst [vmem:[#allocation5 + $0x1c8] sm:$0xff] %v693_v55  ;;  %758 = vst [vmem:[#allocation5 + $0x1d0] sm:$0xff] %v694_v3 }
 0x21f   :  { %759 = vst [vmem:[#allocation5 + $0x1d8] sm:$0xff] %v695_v57  ;;  %760 = vst [vmem:[#allocation5 + $0x1e0] sm:$0xff] %v696_v51 }
 0x220   :  { %761 = vst [vmem:[#allocation5 + $0x1e8] sm:$0xff] %v697_v34  ;;  %762 = vst [vmem:[#allocation5 + $0x1f0] sm:$0xff] %v698_v63 }
 0x221   :  { %763 = vst [vmem:[#allocation5 + $0x1f8] sm:$0xff] %v699_v30 }
 0x222   :  { %891 = shalt.err (!%p888_p13)
}
 0x223   :  { %s892_s11 = scalar_lea.hbm %s2572_s1, 8192 }
 0x224   :  { %p893_p0 = scmp.ne.s32.totalorder %s2572_s1, %s892_s11  ;;  %p896_p1 = scmp.lt.u32.totalorder %s892_s11, %s2572_s1 }
 0x226   :  { %p898_p2 = pnand %p896_p1, %p893_p0 }
 0x228   :  { %901 = shalt.err (!%p898_p2)
}
 0x229   :  { %775 = dma.vmem_to_hbm [thread:$0]  %s770_s7, 8192, %s2572_s1, [#allocation4], %s907_s16, %s907_s16, %s908_s17  }
 0x22a   :  { %904 = dma.done.wait [#allocation4], 8192  }
 0x22b   :  { %905 = vsyncadd [#allocation4], 4294959104 }
 0x22c   :  { %779 = vsyncpa [#allocation3], 1 }
 0x22d   :  { %780 = vsyncpa [#allocation4], 1 }

</bundles_post_ra>
